<compile_context>
chip_gen: v7x
topology: tpu7x:2x2x1
jax: 0.10.0
libtpu: 0.0.40
codegen_flags: <defaults>
</compile_context>

<pallas_src>
import functools

import jax
import jax.numpy as jnp
from jax import lax
from jax.experimental import pallas as pl
from jax.experimental.pallas import tpu as pltpu


def _round_up(x, m):
    return ((x + m - 1) // m) * m


# --------------------------------------------------------------------------
# Pallas kernel: fused loc+cls 3x3 "same" conv (stride 1, pre-padded input)
# computed as 9 accumulating MXU dots; lane-dense (Cout padded to 128) output.
# --------------------------------------------------------------------------
def _fused_head_conv_kernel(x_ref, w_ref, b_ref, o_ref, *, H, W, Cin):
    # x_ref: (TB, H+2, W+2, Cin)   bf16, padded NHWC batch tile
    # w_ref: (9*Cin, Cout_pad)     bf16, HWIO weights flattened (ky, kx, cin)
    # b_ref: (1, Cout_pad)         f32, fused bias (loc || cls || zero pad)
    # o_ref: (TB, H*W, Cout_pad)   f32, flat output tile
    TB = x_ref.shape[0]
    Cout = w_ref.shape[1]
    rows = TB * H * W

    x = x_ref[...]                       # one load of the input tile (bf16)
    w = w_ref[...]                       # (9*Cin, Cout_pad) bf16

    acc = jnp.zeros((rows, Cout), jnp.float32)
    for ky in range(3):                  # static unroll: 9 accumulating dots
        for kx in range(3):
            xs = x[:, ky:ky + H, kx:kx + W, :].reshape(rows, Cin)
            ws = w[(ky * 3 + kx) * Cin:(ky * 3 + kx + 1) * Cin, :]
            acc = acc + jnp.dot(xs, ws, preferred_element_type=jnp.float32)

    acc = acc + b_ref[...]               # f32 bias broadcast over rows
    o_ref[...] = acc.reshape(TB, H * W, Cout).astype(o_ref.dtype)


def fused_head_conv(fm_nchw, w_mat_bf16, b_row_f32):
    """Fused loc+cls 3x3 conv for one SSD head.

    fm_nchw:    (N, Cin, H, W) f32 feature map (PyTorch NCHW convention).
    w_mat_bf16: (9*Cin, Cout_pad) bf16, HWIO weights flattened, Cout padded to 128.
    b_row_f32:  (1, Cout_pad) f32 fused bias.
    Returns (N, H*W, Cout_pad) f32 flat predictions.
    """
    N, Cin, H, W = fm_nchw.shape
    Cout_pad = w_mat_bf16.shape[1]

    # NCHW -> NHWC, bf16 cast, halo pad: one fused XLA expression (single pass).
    x_pad = jnp.pad(
        jnp.transpose(fm_nchw, (0, 2, 3, 1)).astype(jnp.bfloat16),
        ((0, 0), (1, 1), (1, 1), (0, 0)))

    # Batch tile: whole batch in one grid step when small (amortize per-step
    # overhead), else one image per "parallel" step.
    per_img = ((H + 2) * (W + 2) * Cin * 2          # bf16 input tile
               + H * W * Cout_pad * (4 + 4 + 4))    # f32 acc + dbl-buffered out
    tb = N if N * per_img <= (8 << 20) else 1
    grid = (N // tb,)

    kern = functools.partial(_fused_head_conv_kernel, H=H, W=W, Cin=Cin)
    return pl.pallas_call(
        kern,
        out_shape=jax.ShapeDtypeStruct((N, H * W, Cout_pad), jnp.float32),
        grid_spec=pltpu.PrefetchScalarGridSpec(
            num_scalar_prefetch=0,
            grid=grid,
            in_specs=[
                pl.BlockSpec((tb, H + 2, W + 2, Cin), lambda n: (n, 0, 0, 0)),
                pl.BlockSpec((9 * Cin, Cout_pad), lambda n: (0, 0)),
                pl.BlockSpec((1, Cout_pad), lambda n: (0, 0)),
            ],
            out_specs=pl.BlockSpec((tb, H * W, Cout_pad), lambda n: (n, 0, 0)),
        ),
        compiler_params=pltpu.CompilerParams(
            dimension_semantics=("parallel",)),
    )(x_pad, w_mat_bf16, b_row_f32)


# --------------------------------------------------------------------------
# MultiBoxLayer
# --------------------------------------------------------------------------
class MultiBoxLayer:
    def __init__(self, num_classes, num_anchors, in_planes, key):
        self.num_classes = num_classes
        self.num_anchors = list(num_anchors)
        self.in_planes = list(in_planes)
        self.params = []        # separate (w_loc, b_loc, w_cls, b_cls) for reference
        self.fused_params = []  # (w_mat bf16, b_row f32, real Cout) for the kernel
        for i, (a, c_in) in enumerate(zip(num_anchors, in_planes)):
            k = jax.random.fold_in(key, i)
            k1, k2, k3, k4 = jax.random.split(k, 4)
            loc_out = a * 4
            cls_out = a * (num_classes + 1)
            # deterministic synthetic init (HWIO layout)
            w_loc = 0.05 * jax.random.normal(k1, (3, 3, c_in, loc_out), jnp.float32)
            b_loc = 0.01 * jax.random.normal(k2, (loc_out,), jnp.float32)
            w_cls = 0.05 * jax.random.normal(k3, (3, 3, c_in, cls_out), jnp.float32)
            b_cls = 0.01 * jax.random.normal(k4, (cls_out,), jnp.float32)
            self.params.append((w_loc, b_loc, w_cls, b_cls))

            cout = loc_out + cls_out
            cout_pad = _round_up(cout, 128)          # lane-dense output width
            w_cat = jnp.concatenate([w_loc, w_cls], axis=-1)          # (3,3,Cin,cout)
            w_cat = jnp.pad(w_cat, ((0, 0), (0, 0), (0, 0), (0, cout_pad - cout)))
            w_mat = w_cat.reshape(9 * c_in, cout_pad).astype(jnp.bfloat16)
            b_cat = jnp.concatenate([b_loc, b_cls])
            b_row = jnp.pad(b_cat, (0, cout_pad - cout)).reshape(1, cout_pad)  # f32
            self.fused_params.append((w_mat, b_row, cout))

    def __call__(self, fms_nchw):
        loc_preds, cls_preds = [], []
        for (w_mat, b_row, cout), fm, a in zip(self.fused_params, fms_nchw,
                                               self.num_anchors):
            out = fused_head_conv(fm, w_mat, b_row)   # (N, H*W, Cout_pad) f32
            n = out.shape[0]
            loc_out = a * 4
            # Slice the zero lane-padding off BEFORE the reshape so anchor
            # interleaving matches permute(0,2,3,1).view(...) semantics.
            loc = out[:, :, :loc_out]                 # (N, H*W, A*4)
            cls = out[:, :, loc_out:cout]             # (N, H*W, A*(C+1))
            loc_preds.append(loc.reshape(n, -1, 4))
            cls_preds.append(cls.reshape(n, -1, self.num_classes + 1))
        return (jnp.concatenate(loc_preds, axis=1),
                jnp.concatenate(cls_preds, axis=1))


# --------------------------------------------------------------------------
# Pure-JAX references for verification
# --------------------------------------------------------------------------
def _ref_conv3x3(x_nhwc, w_hwio, b):
    out = lax.conv_general_dilated(
        x_nhwc, w_hwio, window_strides=(1, 1), padding="SAME",
        dimension_numbers=("NHWC", "HWIO", "NHWC"),
        preferred_element_type=jnp.float32)
    return out + b[None, None, None, :].astype(jnp.float32)


def _ref_forward(mbox, fms_nchw, cast_bf16):
    """cast_bf16=True mimics the kernel's bf16 inputs (f32 accumulation)."""
    loc_preds, cls_preds = [], []
    for (w_loc, b_loc, w_cls, b_cls), fm in zip(mbox.params, fms_nchw):
        x = jnp.transpose(fm, (0, 2, 3, 1))
        if cast_bf16:
            x = x.astype(jnp.bfloat16)
            w_loc = w_loc.astype(jnp.bfloat16)
            w_cls = w_cls.astype(jnp.bfloat16)
        loc = _ref_conv3x3(x, w_loc, b_loc)
        cls = _ref_conv3x3(x, w_cls, b_cls)
        n = loc.shape[0]
        loc_preds.append(loc.reshape(n, -1, 4))
        cls_preds.append(cls.reshape(n, -1, mbox.num_classes + 1))
    return (jnp.concatenate(loc_preds, axis=1),
            jnp.concatenate(cls_preds, axis=1))


if __name__ == "__main__":
    key = jax.random.PRNGKey(0)

    num_classes = 4            # -> cls channels per anchor = 5
    num_anchors = [4, 6]
    in_planes = [16, 32]

    # Two small feature maps in NCHW, matching the PyTorch convention.
    k_fm0, k_fm1, k_par = jax.random.split(key, 3)
    fm0 = jax.random.normal(k_fm0, (2, 16, 8, 8), jnp.float32)   # (N, C, H, W)
    fm1 = jax.random.normal(k_fm1, (2, 32, 4, 4), jnp.float32)
    fms = [fm0, fm1]

    mbox = MultiBoxLayer(num_classes, num_anchors, in_planes, k_par)

    loc_preds, cls_preds = mbox(fms)
    loc_preds = jax.block_until_ready(loc_preds)
    cls_preds = jax.block_until_ready(cls_preds)

    # Expected: anchors = 8*8*4 + 4*4*6 = 256 + 96 = 352
    assert loc_preds.shape == (2, 352, 4), loc_preds.shape
    assert cls_preds.shape == (2, 352, num_classes + 1), cls_preds.shape

    # Tight check: reference conv on the same bf16-cast inputs (f32 accumulate).
    ref_loc_bf, ref_cls_bf = _ref_forward(mbox, fms, cast_bf16=True)
    assert jnp.allclose(loc_preds, ref_loc_bf, atol=1e-3, rtol=1e-3)
    assert jnp.allclose(cls_preds, ref_cls_bf, atol=1e-3, rtol=1e-3)

    # Semantic check: full-f32 reference (bf16 quantization error only).
    ref_loc, ref_cls = _ref_forward(mbox, fms, cast_bf16=False)
    assert jnp.allclose(loc_preds, ref_loc, atol=5e-2, rtol=5e-2)
    assert jnp.allclose(cls_preds, ref_cls, atol=5e-2, rtol=5e-2)

    print("KERNEL_OK")
</pallas_src>

<mosaic_0001>
module attributes {stable_mosaic.version = 11 : i64} {
  func.func @_fused_head_conv_kernel(%arg0: i32, %arg1: memref<2x10x10x16xbf16, #tpu.memory_space<vmem>>, %arg2: memref<144x128xbf16, #tpu.memory_space<vmem>>, %arg3: memref<1x128xf32, #tpu.memory_space<vmem>>, %arg4: memref<2x64x128xf32, #tpu.memory_space<vmem>>) attributes {dimension_semantics = [#tpu.dimension_semantics<parallel>], iteration_bounds = array<i64: 1>, scalar_prefetch = 0 : i64, scratch_operands = 0 : i64, tpu.core_type = #tpu.core_type<tc>, window_params = [{transform_indices = @transform_0, window_bounds = array<i64: 2, 10, 10, 16>}, {pipeline_mode = #tpu.pipeline_mode<synchronous>, transform_indices = @transform_1, window_bounds = array<i64: 144, 128>}, {pipeline_mode = #tpu.pipeline_mode<synchronous>, transform_indices = @transform_2, window_bounds = array<i64: 1, 128>}, {transform_indices = @transform_3, window_bounds = array<i64: 2, 64, 128>}]} {
    %c0 = arith.constant 0 : index
    %c0_0 = arith.constant 0 : index
    %c0_1 = arith.constant 0 : index
    %c0_2 = arith.constant 0 : index
    %0 = vector.load %arg1[%c0, %c0_0, %c0_1, %c0_2] : memref<2x10x10x16xbf16, #tpu.memory_space<vmem>>, vector<2x10x10x16xbf16>
    %c0_3 = arith.constant 0 : index
    %c0_4 = arith.constant 0 : index
    %1 = vector.load %arg2[%c0_3, %c0_4] : memref<144x128xbf16, #tpu.memory_space<vmem>>, vector<144x128xbf16>
    %cst = arith.constant 0.000000e+00 : f32
    %2 = vector.broadcast %cst : f32 to vector<128x128xf32>
    %3 = vector.extract_strided_slice %0 {offsets = [0, 0, 0, 0], sizes = [2, 8, 8, 16], strides = [1, 1, 1, 1]} : vector<2x10x10x16xbf16> to vector<2x8x8x16xbf16>
    %4 = vector.shape_cast %3 : vector<2x8x8x16xbf16> to vector<128x16xbf16>
    %5 = vector.extract_strided_slice %1 {offsets = [0, 0], sizes = [16, 128], strides = [1, 1]} : vector<144x128xbf16> to vector<16x128xbf16>
    %cst_5 = arith.constant dense<0.000000e+00> : vector<128x128xf32>
    %6 = tpu.matmul %4, %5, %cst_5 {dimension_numbers = #tpu.dot_dimension_numbers<[1], [0], [0], [1], [0, 0, 1, 1], [], []>} : vector<128x16xbf16>, vector<16x128xbf16>, vector<128x128xf32> -> vector<128x128xf32>
    %7 = arith.addf %2, %6 : vector<128x128xf32>
    %8 = vector.extract_strided_slice %0 {offsets = [0, 0, 1, 0], sizes = [2, 8, 8, 16], strides = [1, 1, 1, 1]} : vector<2x10x10x16xbf16> to vector<2x8x8x16xbf16>
    %9 = vector.shape_cast %8 : vector<2x8x8x16xbf16> to vector<128x16xbf16>
    %10 = vector.extract_strided_slice %1 {offsets = [16, 0], sizes = [16, 128], strides = [1, 1]} : vector<144x128xbf16> to vector<16x128xbf16>
    %cst_6 = arith.constant dense<0.000000e+00> : vector<128x128xf32>
    %11 = tpu.matmul %9, %10, %cst_6 {dimension_numbers = #tpu.dot_dimension_numbers<[1], [0], [0], [1], [0, 0, 1, 1], [], []>} : vector<128x16xbf16>, vector<16x128xbf16>, vector<128x128xf32> -> vector<128x128xf32>
    %12 = arith.addf %7, %11 : vector<128x128xf32>
    %13 = vector.extract_strided_slice %0 {offsets = [0, 0, 2, 0], sizes = [2, 8, 8, 16], strides = [1, 1, 1, 1]} : vector<2x10x10x16xbf16> to vector<2x8x8x16xbf16>
    %14 = vector.shape_cast %13 : vector<2x8x8x16xbf16> to vector<128x16xbf16>
    %15 = vector.extract_strided_slice %1 {offsets = [32, 0], sizes = [16, 128], strides = [1, 1]} : vector<144x128xbf16> to vector<16x128xbf16>
    %cst_7 = arith.constant dense<0.000000e+00> : vector<128x128xf32>
    %16 = tpu.matmul %14, %15, %cst_7 {dimension_numbers = #tpu.dot_dimension_numbers<[1], [0], [0], [1], [0, 0, 1, 1], [], []>} : vector<128x16xbf16>, vector<16x128xbf16>, vector<128x128xf32> -> vector<128x128xf32>
    %17 = arith.addf %12, %16 : vector<128x128xf32>
    %18 = vector.extract_strided_slice %0 {offsets = [0, 1, 0, 0], sizes = [2, 8, 8, 16], strides = [1, 1, 1, 1]} : vector<2x10x10x16xbf16> to vector<2x8x8x16xbf16>
    %19 = vector.shape_cast %18 : vector<2x8x8x16xbf16> to vector<128x16xbf16>
    %20 = vector.extract_strided_slice %1 {offsets = [48, 0], sizes = [16, 128], strides = [1, 1]} : vector<144x128xbf16> to vector<16x128xbf16>
    %cst_8 = arith.constant dense<0.000000e+00> : vector<128x128xf32>
    %21 = tpu.matmul %19, %20, %cst_8 {dimension_numbers = #tpu.dot_dimension_numbers<[1], [0], [0], [1], [0, 0, 1, 1], [], []>} : vector<128x16xbf16>, vector<16x128xbf16>, vector<128x128xf32> -> vector<128x128xf32>
    %22 = arith.addf %17, %21 : vector<128x128xf32>
    %23 = vector.extract_strided_slice %0 {offsets = [0, 1, 1, 0], sizes = [2, 8, 8, 16], strides = [1, 1, 1, 1]} : vector<2x10x10x16xbf16> to vector<2x8x8x16xbf16>
    %24 = vector.shape_cast %23 : vector<2x8x8x16xbf16> to vector<128x16xbf16>
    %25 = vector.extract_strided_slice %1 {offsets = [64, 0], sizes = [16, 128], strides = [1, 1]} : vector<144x128xbf16> to vector<16x128xbf16>
    %cst_9 = arith.constant dense<0.000000e+00> : vector<128x128xf32>
    %26 = tpu.matmul %24, %25, %cst_9 {dimension_numbers = #tpu.dot_dimension_numbers<[1], [0], [0], [1], [0, 0, 1, 1], [], []>} : vector<128x16xbf16>, vector<16x128xbf16>, vector<128x128xf32> -> vector<128x128xf32>
    %27 = arith.addf %22, %26 : vector<128x128xf32>
    %28 = vector.extract_strided_slice %0 {offsets = [0, 1, 2, 0], sizes = [2, 8, 8, 16], strides = [1, 1, 1, 1]} : vector<2x10x10x16xbf16> to vector<2x8x8x16xbf16>
    %29 = vector.shape_cast %28 : vector<2x8x8x16xbf16> to vector<128x16xbf16>
    %30 = vector.extract_strided_slice %1 {offsets = [80, 0], sizes = [16, 128], strides = [1, 1]} : vector<144x128xbf16> to vector<16x128xbf16>
    %cst_10 = arith.constant dense<0.000000e+00> : vector<128x128xf32>
    %31 = tpu.matmul %29, %30, %cst_10 {dimension_numbers = #tpu.dot_dimension_numbers<[1], [0], [0], [1], [0, 0, 1, 1], [], []>} : vector<128x16xbf16>, vector<16x128xbf16>, vector<128x128xf32> -> vector<128x128xf32>
    %32 = arith.addf %27, %31 : vector<128x128xf32>
    %33 = vector.extract_strided_slice %0 {offsets = [0, 2, 0, 0], sizes = [2, 8, 8, 16], strides = [1, 1, 1, 1]} : vector<2x10x10x16xbf16> to vector<2x8x8x16xbf16>
    %34 = vector.shape_cast %33 : vector<2x8x8x16xbf16> to vector<128x16xbf16>
    %35 = vector.extract_strided_slice %1 {offsets = [96, 0], sizes = [16, 128], strides = [1, 1]} : vector<144x128xbf16> to vector<16x128xbf16>
    %cst_11 = arith.constant dense<0.000000e+00> : vector<128x128xf32>
    %36 = tpu.matmul %34, %35, %cst_11 {dimension_numbers = #tpu.dot_dimension_numbers<[1], [0], [0], [1], [0, 0, 1, 1], [], []>} : vector<128x16xbf16>, vector<16x128xbf16>, vector<128x128xf32> -> vector<128x128xf32>
    %37 = arith.addf %32, %36 : vector<128x128xf32>
    %38 = vector.extract_strided_slice %0 {offsets = [0, 2, 1, 0], sizes = [2, 8, 8, 16], strides = [1, 1, 1, 1]} : vector<2x10x10x16xbf16> to vector<2x8x8x16xbf16>
    %39 = vector.shape_cast %38 : vector<2x8x8x16xbf16> to vector<128x16xbf16>
    %40 = vector.extract_strided_slice %1 {offsets = [112, 0], sizes = [16, 128], strides = [1, 1]} : vector<144x128xbf16> to vector<16x128xbf16>
    %cst_12 = arith.constant dense<0.000000e+00> : vector<128x128xf32>
    %41 = tpu.matmul %39, %40, %cst_12 {dimension_numbers = #tpu.dot_dimension_numbers<[1], [0], [0], [1], [0, 0, 1, 1], [], []>} : vector<128x16xbf16>, vector<16x128xbf16>, vector<128x128xf32> -> vector<128x128xf32>
    %42 = arith.addf %37, %41 : vector<128x128xf32>
    %43 = vector.extract_strided_slice %0 {offsets = [0, 2, 2, 0], sizes = [2, 8, 8, 16], strides = [1, 1, 1, 1]} : vector<2x10x10x16xbf16> to vector<2x8x8x16xbf16>
    %44 = vector.shape_cast %43 : vector<2x8x8x16xbf16> to vector<128x16xbf16>
    %45 = vector.extract_strided_slice %1 {offsets = [128, 0], sizes = [16, 128], strides = [1, 1]} : vector<144x128xbf16> to vector<16x128xbf16>
    %cst_13 = arith.constant dense<0.000000e+00> : vector<128x128xf32>
    %46 = tpu.matmul %44, %45, %cst_13 {dimension_numbers = #tpu.dot_dimension_numbers<[1], [0], [0], [1], [0, 0, 1, 1], [], []>} : vector<128x16xbf16>, vector<16x128xbf16>, vector<128x128xf32> -> vector<128x128xf32>
    %47 = arith.addf %42, %46 : vector<128x128xf32>
    %c0_14 = arith.constant 0 : index
    %c0_15 = arith.constant 0 : index
    %48 = vector.load %arg3[%c0_14, %c0_15] : memref<1x128xf32, #tpu.memory_space<vmem>>, vector<1x128xf32>
    %49 = vector.broadcast %48 : vector<1x128xf32> to vector<128x128xf32>
    %50 = arith.addf %47, %49 : vector<128x128xf32>
    %51 = vector.shape_cast %50 : vector<128x128xf32> to vector<2x64x128xf32>
    %c0_16 = arith.constant 0 : index
    %c0_17 = arith.constant 0 : index
    %c0_18 = arith.constant 0 : index
    %52 = vector.load %arg4[%c0_16, %c0_17, %c0_18] : memref<2x64x128xf32, #tpu.memory_space<vmem>>, vector<2x64x128xf32>
    tpu.vector_store %arg4[%c0_16, %c0_17, %c0_18], %51 {strides = array<i32>} : memref<2x64x128xf32, #tpu.memory_space<vmem>>, vector<2x64x128xf32>,
    return
  }
  func.func @transform_0(%arg0: i32) -> (i32, i32, i32, i32) {
    %c0_i32 = arith.constant 0 : i32
    %c0_i32_0 = arith.constant 0 : i32
    %c0_i32_1 = arith.constant 0 : i32
    %c0_i32_2 = arith.constant 0 : i32
    return %arg0, %c0_i32, %c0_i32_0, %c0_i32_1 : i32, i32, i32, i32
  }
  func.func @transform_1(%arg0: i32) -> (i32, i32) {
    %c0_i32 = arith.constant 0 : i32
    %c0_i32_0 = arith.constant 0 : i32
    %c0_i32_1 = arith.constant 0 : i32
    return %c0_i32, %c0_i32_0 : i32, i32
  }
  func.func @transform_2(%arg0: i32) -> (i32, i32) {
    %c0_i32 = arith.constant 0 : i32
    %c0_i32_0 = arith.constant 0 : i32
    %c0_i32_1 = arith.constant 0 : i32
    return %c0_i32, %c0_i32_0 : i32, i32
  }
  func.func @transform_3(%arg0: i32) -> (i32, i32, i32) {
    %c0_i32 = arith.constant 0 : i32
    %c0_i32_0 = arith.constant 0 : i32
    %c0_i32_1 = arith.constant 0 : i32
    return %arg0, %c0_i32, %c0_i32_0 : i32, i32, i32
  }
}

</mosaic_0001>

<bundles_post_ra>
// kernel: tpu_custom_call.1
= control target key start
LH: loop header
LB: loop body
LE: loop exit
PB: predicated region body
PF: predicated region fallthrough
CT: control target
= control target key end

     0   :  { %vm74_vm0 = vsmask.f32 3328  ;;  %vm75_vm1 = vsmask.f32 7440  ;;  %vm331_vm2 = vcmask 130048   ;;  %vm636_vm4 = vcmask 1042432   ;;  %s3208_s0 = inlined_call_operand.vmem [shape: bf16[2,10,10,16], index: 0, kind: input, shape index: {}]   ;;  %s3209_s1 = inlined_call_operand.vmem [shape: bf16[144,128], index: 1, kind: input, shape index: {}]   ;;  %s3210_s2 = inlined_call_operand.vmem [shape: f32[1,128], index: 2, kind: input, shape index: {}]   ;;  %s3211_s3 = inlined_call_operand.hbm [shape: f32[2,64,128], index: 3, kind: output, shape index: {}]  }
   0x1   :  { %v2383_v0 = vld [vmem:[%s3209_s1 + $0x8] sm:$0xff]   ;;  %v2463_v1 = vld [vmem:[%s3209_s1 + $0x20] sm:$0xff]   ;;  %v2507_v21 = vld [vmem:[%s3208_s0 + $0x10] sm:$0xf]  ;;  %vm637_vm5 = vcmask 1046532  }
   0x2   :  { %2088 = vmatprep.subr.bf16.mxu1 %v2383_v0  ;;  %v2468_v2 = vld [vmem:[%s3208_s0] sm:$0xf]  ;;  %v2473_v3 = vld [vmem:[%s3208_s0 + $0x4] sm:$0x1]  ;;  %v2478_v4 = vld [vmem:[%s3208_s0 + $0x8] sm:$0xf]  ;;  %2160 = vmatprep.subr.bf16.mxu0 %v2463_v1 }
   0x3   :  { %2089 = vmatpush3.bf16.msra.mxu1 %v2383_v0  ;;  %v2484_v5 = vld [vmem:[%s3208_s0 + $0xc] sm:$0x1]  ;;  %2161 = vmatpush3.bf16.msra.mxu0 %v2463_v1  ;;  %v78_v6 = vshrl.u32 %v2468_v2, 16  ;;  %v81_v7 = vshll.u32 %v2468_v2, 16  ;;  %v87_v8 = vshll.u32 %v2473_v3, 16  ;;  %v92_v9 = vshrl.u32 %v2478_v4, 16  ;;  %vm2535_vm3 = vmor %vm74_vm0, %vm75_vm1 }
   0x4   :  { %v95_v10 = vshll.u32 %v2478_v4, 16  ;;  %v101_v11 = vshll.u32 %v2484_v5, 16  ;;  %v645_v12 = vrot.slane %v2484_v5, 5  ;;  %v2497_v17 = vld [vmem:[%s3209_s1] sm:$0xff]   ;;  %v2502_v18 = vld [vmem:[%s3209_s1 + $0x28] sm:$0xff]   ;;  %v106_v31 = vshrl.u32 %v2507_v21, 16  ;;  %vm2691_vm6 = vmor %vm636_vm4, %vm637_vm5 }
   0x5   :  { %v80_v13 = vrot.slane %v78_v6, 4  ;;  %v83_v14 = vrot.slane %v81_v7, 5  ;;  %v89_v15 = vrot.slane %v87_v8, 5  ;;  %v94_v16 = vrot.slane %v92_v9, 4  ;;  %v2512_v22 = vld [vmem:[%s3208_s0 + $0x14] sm:$0x1]  ;;  %2106 = vmatprep.subr.bf16.mxu1 %v2497_v17  ;;  %2178 = vmatprep.subr.bf16.mxu0 %v2502_v18 }
   0x6   :  { %v97_v19 = vrot.slane %v95_v10, 5  ;;  %v103_v20 = vrot.slane %v101_v11, 5  ;;  %v2518_v24 = vld [vmem:[%s3208_s0 + $0x18] sm:$0xf]  ;;  %v2523_v25 = vld [vmem:[%s3208_s0 + $0x1c] sm:$0x1] }
   0x7   :  { %v84_v23 = vor.u32 %v83_v14, %v80_v13  ;;  %v2528_v26 = vld [vmem:[%s3208_s0 + $0x20] sm:$0xf]  ;;  %v2542_v30 = vld [vmem:[%s3208_s0 + $0x24] sm:$0x1]  ;;  %v109_v32 = vshll.u32 %v2507_v21, 16  ;;  %v115_v33 = vshll.u32 %v2512_v22, 16 }
   0x8   :  { %v98_v29 = vor.u32 %v97_v19, %v94_v16  ;;  %v120_v35 = vshrl.u32 %v2518_v24, 16  ;;  %v123_v36 = vshll.u32 %v2518_v24, 16  ;;  %v129_v37 = vshll.u32 %v2523_v25, 16  ;;  %v2559_v50 = vld [vmem:[%s3208_s0 + $0x28] sm:$0xf] }
   0x9   :  { %v85_v34 = vrot.slane %v84_v23, 4  ;;  %v108_v39 = vrot.slane %v106_v31, 4  ;;  %v111_v40 = vrot.slane %v109_v32, 5  ;;  %v117_v41 = vrot.slane %v115_v33, 5  ;;  %v2566_v55 = vld [vmem:[%s3208_s0 + $0x2c] sm:$0x1] }
   0xa   :  { %v99_v38 = vrot.slane %v98_v29, 4  ;;  %v122_v43 = vrot.slane %v120_v35, 4  ;;  %v125_v44 = vrot.slane %v123_v36, 5  ;;  %v131_v45 = vrot.slane %v129_v37, 5  ;;  %v2572_v60 = vld [vmem:[%s3208_s0 + $0x30] sm:$0xf] }
   0xb   :  { %v90_v42 = vsel %vm2535_vm3, %v85_v34, %v89_v15  ;;  %v112_v47 = vor.u32 %v111_v40, %v108_v39  ;;  %v134_v48 = vshrl.u32 %v2528_v26, 16  ;;  %v137_v49 = vshll.u32 %v2528_v26, 16  ;;  %v2584_v10 = vld [vmem:[%s3208_s0 + $0x34] sm:$0x1]  ;;  %v2589_v11 = vld [vmem:[%s3208_s0 + $0x38] sm:$0xf] }
   0xc   :  { %v104_v46 = vsel %vm2535_vm3, %v99_v38, %v103_v20  ;;  %v126_v52 = vor.u32 %v125_v44, %v122_v43  ;;  %v143_v53 = vshll.u32 %v2542_v30, 16  ;;  %v649_v54 = vrot.slane %v2512_v22, 5  ;;  %3220 = vst [vmem:[#allocation5_spill] sm:$0xff] %v2589_v11  ;;  %v2597_v19 = vld [vmem:[%s3208_s0 + $0x3c] sm:$0x1]  ;;  %v2614_v34 = vld [vmem:[%s3209_s1 + $0x10] sm:$0xff]  }
   0xd   :  { %v1851_v51 = vcombine.low %v90_v42, %v104_v46  ;;  %v113_v56 = vrot.slane %v112_v47, 4  ;;  %v136_v57 = vrot.slane %v134_v48, 4  ;;  %v139_v58 = vrot.slane %v137_v49, 5  ;;  %v2602_v20 = vld [vmem:[%s3208_s0 + $0x40] sm:$0xf]  ;;  %v2635_v48 = vld [vmem:[%s3209_s1 + $0x30] sm:$0xff]  }
   0xe   :  { %v653_v59 = vrot.slane %v2523_v25, 5  ;;  %v127_v61 = vrot.slane %v126_v52, 4  ;;  %v145_v62 = vrot.slane %v143_v53, 5  ;;  %v657_v63 = vrot.slane %v2542_v30, 5  ;;  %v2609_v33 = vld [vmem:[%s3208_s0 + $0x44] sm:$0x1] }
   0xf   :  { %2090 = vmatprep.mubr.msk.bf16.mxu1 %vm331_vm2, %v1851_v51  ;;  %v148_v0 = vshrl.u32 %v2559_v50, 16  ;;  %v118_v6 = vsel %vm2535_vm3, %v113_v56, %v117_v41  ;;  %v140_v7 = vor.u32 %v139_v58, %v136_v57  ;;  %v151_v8 = vshll.u32 %v2559_v50, 16  ;;  %v2629_v43 = vld [vmem:[%s3208_s0 + $0x50] sm:$0xf]  ;;  %v2645_v58 = vld [vmem:[%s3208_s0 + $0x54] sm:$0x1] }
  0x10   :  { %v157_v9 = vshll.u32 %v2566_v55, 16  ;;  %v132_v13 = vsel %vm2535_vm3, %v127_v61, %v131_v45  ;;  %v1935_v14 = vcombine.low %v104_v46, %v118_v6  ;;  %v162_v16 = vshrl.u32 %v2572_v60, 16  ;;  %v2768_v30 = vld [vmem:[%s3208_s0 + $0x78] sm:$0xf] }
  0x11   :  { %v150_v15 = vrot.slane %v148_v0, 4  ;;  %v141_v23 = vrot.slane %v140_v7, 4  ;;  %v2604_v29 = vcombine.low %v118_v6, %v132_v13  ;;  %v153_v31 = vrot.slane %v151_v8, 5  ;;  %v2654_v7 = vld [vmem:[%s3208_s0 + $0x58] sm:$0xf] }
  0x12   :  { %v159_v32 = vrot.slane %v157_v9, 5  ;;  %2162 = vmatprep.mubr.msk.bf16.mxu0 %vm331_vm2, %v1935_v14  ;;  %v164_v35 = vrot.slane %v162_v16, 4  ;;  %v165_v36 = vshll.u32 %v2572_v60, 16  ;;  %v171_v37 = vshll.u32 %v2584_v10, 16  ;;  %3221 = vst [vmem:[#allocation6_spill] sm:$0xff] %v2654_v7 }
  0x13   :  { %v176_v38 = vshrl.u32 %v2589_v11, 16  ;;  %v146_v39 = vsel %vm2535_vm3, %v141_v23, %v145_v62  ;;  %2091 = vmatmul.mubr.msk.bf16.vlgmr.msra.gmra.mrb[0].mxu1 %vm331_vm2, %v2604_v29  ;;  %v154_v40 = vor.u32 %v153_v31, %v150_v15  ;;  %v179_v41 = vshll.u32 %v2589_v11, 16 }
  0x14   :  { %v185_v42 = vshll.u32 %v2597_v19, 16  ;;  %v1936_v44 = vcombine.low %v132_v13, %v146_v39  ;;  %2107 = vmatpush3.bf16.msra.mxu1 %v2497_v17  ;;  %v167_v45 = vrot.slane %v165_v36, 5  ;;  %v173_v46 = vrot.slane %v171_v37, 5  ;;  %v2668_v36 = vld [vmem:[%s3208_s0 + $0x5c] sm:$0x1] }
  0x15   :  { %v178_v47 = vrot.slane %v176_v38, 4  ;;  %v155_v49 = vrot.slane %v154_v40, 4  ;;  %v181_v51 = vrot.slane %v179_v41, 5  ;;  %v1026_v53 = vshrl.u32 %v2602_v20, 16  ;;  %2124 = vmatprep.subr.bf16.mxu1 %v2614_v34 }
  0x16   :  { %v187_v52 = vrot.slane %v185_v42, 5  ;;  %2163 = vmatmul.mubr.msk.bf16.vlgmr.msra.gmra.mrb[0].mxu0 %vm331_vm2, %v1936_v44  ;;  %v168_v56 = vor.u32 %v167_v45, %v164_v35  ;;  %v1029_v17 = vshll.u32 %v2602_v20, 16  ;;  %v1035_v57 = vshll.u32 %v2609_v33, 16 }
  0x17   :  { %v190_v61 = vshrl.u32 %v2629_v43, 16  ;;  %2179 = vmatpush3.bf16.msra.mxu0 %v2502_v18  ;;  %v160_v62 = vsel %vm2535_vm3, %v155_v49, %v159_v32  ;;  %v182_v0 = vor.u32 %v181_v51, %v178_v47  ;;  %v1028_v6 = vrot.slane %v1026_v53, 4  ;;  %v2679_v49 = vld [vmem:[%s3208_s0 + $0x60] sm:$0xf] }
  0x18   :  { %v193_v8 = vshll.u32 %v2629_v43, 16  ;;  %v2657_v9 = vcombine.low %v146_v39, %v160_v62  ;;  %v169_v13 = vrot.slane %v168_v56, 4  ;;  %v1031_v14 = vrot.slane %v1029_v17, 5  ;;  %2196 = vmatprep.subr.bf16.mxu0 %v2635_v48 }
  0x19   :  { %v1037_v15 = vrot.slane %v1035_v57, 5  ;;  %v183_v18 = vrot.slane %v182_v0, 4  ;;  %v192_v16 = vrot.slane %v190_v61, 4  ;;  %v199_v31 = vshll.u32 %v2645_v58, 16  ;;  %v2700_v0 = vld [vmem:[%s3208_s0 + $0x64] sm:$0x1] }
  0x1a   :  { %v195_v23 = vrot.slane %v193_v8, 5  ;;  %2094 = vmatprep.mubr.msk.bf16.mxu1 %vm331_vm2, %v2657_v9  ;;  %v174_v32 = vsel %vm2535_vm3, %v169_v13, %v173_v46  ;;  %v1032_v35 = vor.u32 %v1031_v14, %v1028_v6  ;;  %v204_v37 = vshrl.u32 %v2654_v7, 16  ;;  %v2705_v6 = vld [vmem:[%s3208_s0 + $0x68] sm:$0xf] }
  0x1b   :  { %v207_v38 = vshll.u32 %v2654_v7, 16  ;;  %v1937_v39 = vcombine.low %v160_v62, %v174_v32  ;;  %v188_v40 = vsel %vm2535_vm3, %v183_v18, %v187_v52  ;;  %v201_v42 = vrot.slane %v199_v31, 5  ;;  %v2719_v18 = vld [vmem:[%s3208_s0 + $0x6c] sm:$0x1]  ;;  %v2737_v31 = vld [vmem:[%s3208_s0 + $0x70] sm:$0xf] }
  0x1c   :  { %v196_v41 = vor.u32 %v195_v23, %v192_v16  ;;  %v2674_v44 = vcombine.low %v174_v32, %v188_v40  ;;  %v1033_v45 = vrot.slane %v1032_v35, 4  ;;  %v206_v46 = vrot.slane %v204_v37, 4 }
  0x1d   :  { %v209_v47 = vrot.slane %v207_v38, 5  ;;  %2166 = vmatprep.mubr.msk.bf16.mxu0 %vm331_vm2, %v1937_v39  ;;  %v213_v53 = vshll.u32 %v2668_v36, 16  ;;  %v1886_v52 = vrot.slane %v2478_v4, 9  ;;  %v1887_v61 = vrot.slane %v2507_v21, 9 }
  0x1e   :  { %v197_v51 = vrot.slane %v196_v41, 4  ;;  %2095 = vmatmul.mubr.msk.bf16.gmra.mrb[4].mxu1 %vm331_vm2, %v2674_v44  ;;  %v2688_v56 = vsel %vm2535_vm3, %v1033_v45, %v1037_v15  ;;  %v1888_v62 = vrot.slane %v2518_v24, 9  ;;  %v221_v25 = vshll.u32 %v2679_v49, 16 }
  0x1f   :  { %v210_v17 = vor.u32 %v209_v47, %v206_v46  ;;  %v1938_v8 = vcombine.low %v188_v40, %v2688_v56  ;;  %v215_v14 = vrot.slane %v213_v53, 5  ;;  %v2714_v15 = vsel %vm2691_vm6, %v1886_v52, %v645_v12 }
  0x20   :  { %v202_v13 = vsel %vm2535_vm3, %v197_v51, %v201_v42  ;;  %v2725_v23 = vsel %vm2691_vm6, %v1887_v61, %v649_v54  ;;  %v2731_v5 = vsel %vm2691_vm6, %v1888_v62, %v653_v59  ;;  %v1889_v12 = vrot.slane %v2528_v26, 9  ;;  %v2747_v59 = vld [vmem:[%s3208_s0 + $0x74] sm:$0x1] }
  0x21   :  { %v211_v16 = vrot.slane %v210_v17, 4  ;;  %2167 = vmatmul.mubr.msk.bf16.gmra.mrb[4].mxu0 %vm331_vm2, %v1938_v8  ;;  %v1954_v22 = vcombine.low %v2714_v15, %v2725_v23  ;;  %v218_v54 = vshrl.u32 %v2679_v49, 16  ;;  %v227_v37 = vshll.u32 %v2700_v0, 16 }
  0x22   :  { %v2757_v35 = vsel %vm2691_vm6, %v1889_v12, %v657_v63  ;;  %v232_v38 = vshrl.u32 %v2705_v6, 16  ;;  %v223_v42 = vrot.slane %v221_v25, 5  ;;  %v235_v46 = vshll.u32 %v2705_v6, 16 }
  0x23   :  { %v2751_v32 = vsel %vm2535_vm3, %v211_v16, %v215_v14  ;;  %v1955_v40 = vcombine.low %v2731_v5, %v2757_v35  ;;  %2180 = vmatprep.mubr.msk.bf16.mxu0 %vm331_vm2, %v1954_v22  ;;  %v220_v41 = vrot.slane %v218_v54, 4  ;;  %v229_v63 = vrot.slane %v227_v37, 5 }
  0x24   :  { %v1855_v39 = vcombine.low %v202_v13, %v2751_v32  ;;  %v234_v45 = vrot.slane %v232_v38, 4  ;;  %v241_v47 = vshll.u32 %v2719_v18, 16 }
  0x25   :  { %8 = vsyncpa [#allocation3], 0  ;;  %v224_v51 = vor.u32 %v223_v42, %v220_v41  ;;  %v2776_v53 = vld [vmem:[%s3208_s0 + $0x7c] sm:$0x1]  ;;  %v246_v52 = vshrl.u32 %v2737_v31, 16  ;;  %v249_v17 = vshll.u32 %v2737_v31, 16 }
  0x26   :  { %2098 = vmatprep.mubr.msk.bf16.mxu1 %vm331_vm2, %v1855_v39  ;;  %v255_v61 = vshll.u32 %v2747_v59, 16  ;;  %v237_v62 = vrot.slane %v235_v46, 5  ;;  %v243_v8 = vrot.slane %v241_v47, 5  ;;  %v260_v13 = vshrl.u32 %v2768_v30, 16  ;;  %v2786_v25 = vld [vmem:[%s3209_s1 + $0x38] sm:$0xff]  }
  0x27   :  { %v263_v14 = vshll.u32 %v2768_v30, 16  ;;  %v225_v16 = vrot.slane %v224_v51, 4  ;;  %v248_v12 = vrot.slane %v246_v52, 4  ;;  %v251_v22 = vrot.slane %v249_v17, 5  ;;  %v2792_v42 = vld [vmem:[%s3208_s0 + $0x80] sm:$0xf] }
  0x28   :  { %v257_v54 = vrot.slane %v255_v61, 5  ;;  %v238_v37 = vor.u32 %v237_v62, %v234_v45  ;;  %v262_v38 = vrot.slane %v260_v13, 4  ;;  %v269_v41 = vshll.u32 %v2776_v53, 16  ;;  %v2804_v52 = vld [vmem:[%s3208_s0 + $0x84] sm:$0x1] }
  0x29   :  { %v265_v39 = vrot.slane %v263_v14, 5  ;;  %v2796_v46 = vsel %vm2535_vm3, %v225_v16, %v229_v63  ;;  %2181 = vmatmul.mubr.msk.bf16.vlgmr.msra.gmra.mrb[0].mxu0 %vm331_vm2, %v1955_v40  ;;  %v252_v47 = vor.u32 %v251_v22, %v248_v12  ;;  %v1890_v51 = vrot.slane %v2559_v50, 9  ;;  %v2822_v12 = vld [vmem:[%s3208_s0 + $0x88] sm:$0xf] }
  0x2a   :  { %v661_v45 = vrot.slane %v2566_v55, 5  ;;  %v239_v17 = vrot.slane %v238_v37, 4  ;;  %2197 = vmatpush3.bf16.msra.mxu0 %v2635_v48  ;;  %v271_v62 = vrot.slane %v269_v41, 5  ;;  %v1891_v63 = vrot.slane %v2572_v60, 9 }
  0x2b   :  { %v266_v61 = vor.u32 %v265_v39, %v262_v38  ;;  %v253_v13 = vrot.slane %v252_v47, 4  ;;  %v665_v14 = vrot.slane %v2584_v10, 5  ;;  %v274_v55 = vshrl.u32 %v2792_v42, 16  ;;  %2214 = vmatprep.subr.bf16.mxu0 %v2786_v25  ;;  %v2841_v39 = vld [vmem:[%s3208_s0 + $0x8c] sm:$0x1] }
  0x2c   :  { %v2810_v40 = vsel %vm2691_vm6, %v1890_v51, %v661_v45  ;;  %v2817_v16 = vsel %vm2535_vm3, %v239_v17, %v243_v8  ;;  %v277_v22 = vshll.u32 %v2792_v42, 16  ;;  %v283_v37 = vshll.u32 %v2804_v52, 16 }
  0x2d   :  { %3224 = vst [vmem:[#allocation7_spill] sm:$0xff] %v2817_v16  ;;  %v267_v48 = vrot.slane %v266_v61, 4  ;;  %v2828_v10 = vcombine.low %v2796_v46, %v2817_v16  ;;  %v2832_v38 = vsel %vm2535_vm3, %v253_v13, %v257_v54  ;;  %v2836_v8 = vsel %vm2691_vm6, %v1891_v63, %v665_v14 }
  0x2e   :  { %3225 = vst [vmem:[#allocation8_spill] sm:$0xff] %v2832_v38  ;;  %v276_v41 = vrot.slane %v274_v55, 4  ;;  %v1956_v54 = vcombine.low %v2810_v40, %v2836_v8  ;;  %v279_v45 = vrot.slane %v277_v22, 5  ;;  %v285_v61 = vrot.slane %v283_v37, 5 }
  0x2f   :  { %v2845_v47 = vsel %vm2535_vm3, %v267_v48, %v271_v62  ;;  %2099 = vmatmul.mubr.msk.bf16.gmra.mrb[8].mxu1 %vm331_vm2, %v2828_v10  ;;  %v288_v63 = vshrl.u32 %v2822_v12, 16  ;;  %v291_v62 = vshll.u32 %v2822_v12, 16  ;;  %v297_v14 = vshll.u32 %v2841_v39, 16 }
  0x30   :  { %v2855_v17 = vcombine.low %v2832_v38, %v2845_v47  ;;  %2184 = vmatprep.mubr.msk.bf16.mxu0 %vm331_vm2, %v1956_v54  ;;  %v280_v13 = vor.u32 %v279_v45, %v276_v41  ;;  %v1892_v55 = vrot.slane %v2589_v11, 9  ;;  %v669_v48 = vrot.slane %v2597_v19, 5 }
  0x31   :  { %v290_v22 = vrot.slane %v288_v63, 4  ;;  %v293_v51 = vrot.slane %v291_v62, 5  ;;  %v1952_v37 = vrot.slane %v2602_v20, 9  ;;  %v1210_v27 = vrot.slane %v2609_v33, 5 }
  0x32   :  { %2102 = vmatprep.mubr.msk.bf16.mxu1 %vm331_vm2, %v2855_v17  ;;  %v281_v38 = vrot.slane %v280_v13, 4  ;;  %v299_v16 = vrot.slane %v297_v14, 5  ;;  %v2869_v41 = vsel %vm2691_vm6, %v1892_v55, %v669_v48  ;;  %v1894_v54 = vrot.slane %v2654_v7, 9 }
  0x33   :  { %v294_v45 = vor.u32 %v293_v51, %v290_v22  ;;  %v2874_v19 = vsel %vm2691_vm6, %v1952_v37, %v1210_v27  ;;  %v677_v63 = vrot.slane %v2668_v36, 5  ;;  %v1895_v62 = vrot.slane %v2679_v49, 9 }
  0x34   :  { %v2880_v33 = vsel %vm2535_vm3, %v281_v38, %v285_v61  ;;  %v1957_v13 = vcombine.low %v2869_v41, %v2874_v19  ;;  %v681_v14 = vrot.slane %v2700_v0, 5  ;;  %v1896_v27 = vrot.slane %v2705_v6, 9 }
  0x35   :  { %3226 = vst [vmem:[#allocation9_spill] sm:$0xff] %v2880_v33  ;;  %v295_v55 = vrot.slane %v294_v45, 4  ;;  %v2887_v51 = vsel %vm2691_vm6, %v1894_v54, %v677_v63  ;;  %v685_v36 = vrot.slane %v2719_v18, 5  ;;  %v1868_v38 = vcombine.low %v2468_v2, %v2478_v4 }
  0x36   :  { %2185 = vmatmul.mubr.msk.bf16.gmra.mrb[4].mxu0 %vm331_vm2, %v1957_v13  ;;  %v2896_v61 = vsel %vm2691_vm6, %v1895_v62, %v681_v14  ;;  %v1897_v0 = vrot.slane %v2737_v31, 9  ;;  %v689_v48 = vrot.slane %v2747_v59, 5  ;;  %v1898_v54 = vrot.slane %v2768_v30, 9  ;;  %v2924_v62 = vld [vmem:[%s3208_s0 + $0x90] sm:$0xf] }
  0x37   :  { %v2902_v22 = vsel %vm2535_vm3, %v295_v55, %v299_v16  ;;  %v1958_v18 = vcombine.low %v2887_v51, %v2896_v61  ;;  %v2908_v37 = vsel %vm2691_vm6, %v1896_v27, %v685_v36  ;;  %v693_v16 = vrot.slane %v2776_v53, 5  ;;  %v2929_v13 = vld [vmem:[%s3208_s0 + $0x94] sm:$0x1] }
  0x38   :  { %3227 = vst [vmem:[#allocation10_spill] sm:$0xff] %v2902_v22  ;;  %v2913_v45 = vcombine.low %v2880_v33, %v2902_v22  ;;  %v2917_v59 = vsel %vm2691_vm6, %v1897_v0, %v689_v48  ;;  %v1899_v63 = vrot.slane %v2792_v42, 9  ;;  %v697_v14 = vrot.slane %v2804_v52, 5 }
  0x39   :  { %2188 = vmatprep.mubr.msk.bf16.mxu0 %vm331_vm2, %v1958_v18  ;;  %v1959_v53 = vcombine.low %v2908_v37, %v2917_v59  ;;  %v2939_v55 = vsel %vm2691_vm6, %v1898_v54, %v693_v16  ;;  %v1900_v27 = vrot.slane %v2822_v12, 9  ;;  %v701_v52 = vrot.slane %v2841_v39, 5 }
  0x3a   :  { %2103 = vmatmul.mubr.msk.bf16.gmra.mrb[12].mxu1 %vm331_vm2, %v2913_v45  ;;  %v2945_v36 = vsel %vm2691_vm6, %v1899_v63, %v697_v14  ;;  %v1953_v0 = vrot.slane %v2924_v62, 9  ;;  %v1214_v48 = vrot.slane %v2929_v13, 5  ;;  %v641_v18 = vrot.slane %v2473_v3, 5 }
  0x3b   :  { %2108 = vmatprep.mubr.msk.bf16.mxu1 %vm331_vm2, %v1868_v38  ;;  %v1960_v54 = vcombine.low %v2939_v55, %v2945_v36  ;;  %v1869_v16 = vcombine.low %v2507_v21, %v2518_v24  ;;  %v1870_v38 = vcombine.low %v2528_v26, %v2559_v50  ;;  %v1885_v63 = vrot.slane %v2468_v2, 9  ;;  %v2399_v2 = vld [vmem:[%s3209_s1 + $0x18] sm:$0xff]  }
  0x3c   :  { %v2962_v39 = vsel %vm2691_vm6, %v1900_v27, %v701_v52  ;;  %v2966_v3 = vsel %vm2691_vm6, %v1953_v0, %v1214_v48  ;;  %v1893_v14 = vrot.slane %v2629_v43, 9  ;;  %v673_v22 = vrot.slane %v2645_v58, 5 }
  0x3d   :  { %v1961_v27 = vcombine.low %v2962_v39, %v2966_v3 }
  0x3e   :  { %2189 = vmatmul.mubr.msk.bf16.gmra.mrb[8].mxu0 %vm331_vm2, %v1959_v53  ;;  %v642_v53 = vsel %vm2691_vm6, %v1885_v63, %v641_v18  ;;  %v34_v63 = vld [vmem:[%s3208_s0 + $0x48] sm:$0xf] }
  0x3f   :  { %2192 = vmatprep.mubr.msk.bf16.mxu0 %vm331_vm2, %v1960_v54  ;;  %v2977_v54 = vsel %vm2691_vm6, %v1893_v14, %v673_v22  ;;  %v1871_v22 = vcombine.low %v2572_v60, %v2589_v11  ;;  %v1993_v18 = vrot.slane %v34_v63, 9  ;;  %v2401_v11 = vld [vmem:[%s3209_s1 + $0x40] sm:$0xff]   ;;  %v1971_v57 = vcombine.low %v2602_v20, %v34_v63 }
  0x42   :  { %2109 = vmatmul.mubr.msk.bf16.vlgmr.msra.gmra.mrb[0].mxu1 %vm331_vm2, %v1869_v16 }
  0x43   :  { %2125 = vmatpush3.bf16.msra.mxu1 %v2614_v34  ;;  %2112 = vmatprep.mubr.msk.bf16.mxu1 %vm331_vm2, %v1870_v38  ;;  %v1872_v34 = vcombine.low %v2629_v43, %v2654_v7  ;;  %v3013_v43 = vld [vmem:[%s3208_s0 + $0x98] sm:$0xf] }
  0x44   :  { %2142 = vmatprep.subr.bf16.mxu1 %v2399_v2  ;;  %v1994_v48 = vrot.slane %v3013_v43, 9 }
  0x46   :  { %2193 = vmatmul.mubr.msk.bf16.gmra.mrb[12].mxu0 %vm331_vm2, %v1961_v27  ;;  %v35_v27 = vld [vmem:[%s3208_s0 + $0x4c] sm:$0x1] }
  0x47   :  { %2198 = vmatprep.mubr.msk.bf16.mxu0 %vm331_vm2, %v1869_v16  ;;  %v3018_v16 = vld [vmem:[%s3208_s0 + $0x9c] sm:$0x1]  ;;  %v1661_v0 = vrot.slane %v35_v27, 5 }
  0x48   :  { %v1665_v52 = vrot.slane %v3018_v16, 5 }
  0x49   :  { %v3030_v7 = vsel %vm2691_vm6, %v1993_v18, %v1661_v0  ;;  %v1874_v0 = vcombine.low %v2737_v31, %v2768_v30  ;;  %v1903_v18 = vcombine.low %v2757_v35, %v2810_v40  ;;  %v1510_v40 = vshll.u32 %v35_v27, 16 }
  0x4a   :  { %2113 = vmatmul.mubr.msk.bf16.gmra.mrb[4].mxu1 %vm331_vm2, %v1871_v22  ;;  %v1995_v14 = vcombine.low %v2874_v19, %v3030_v7  ;;  %v3039_v58 = vsel %vm2691_vm6, %v1994_v48, %v1665_v52  ;;  %v1875_v52 = vcombine.low %v2792_v42, %v2822_v12  ;;  %v1504_v48 = vshll.u32 %v34_v63, 16  ;;  %v3240_v7 = vld [vmem:[#allocation8_spill] sm:$0xff] }
  0x4b   :  { %2116 = vmatprep.mubr.msk.bf16.mxu1 %vm331_vm2, %v1872_v34  ;;  %v1996_v33 = vcombine.low %v2966_v3, %v3039_v58  ;;  %v1873_v34 = vcombine.low %v2679_v49, %v2705_v6  ;;  %v1043_v27 = vshll.u32 %v2924_v62, 16 }
  0x4e   :  { %2199 = vmatmul.mubr.msk.bf16.vlgmr.msra.gmra.mrb[0].mxu0 %vm331_vm2, %v1870_v38  ;;  %v1901_v38 = vcombine.low %v642_v53, %v2714_v15  ;;  %v1972_v15 = vcombine.low %v2924_v62, %v3013_v43 }
  0x4f   :  { %2215 = vmatpush3.bf16.msra.mxu0 %v2786_v25  ;;  %2202 = vmatprep.mubr.msk.bf16.mxu0 %vm331_vm2, %v1871_v22  ;;  %v1902_v25 = vcombine.low %v2725_v23, %v2731_v5  ;;  %v1501_v22 = vshrl.u32 %v34_v63, 16  ;;  %v1904_v23 = vcombine.low %v2836_v8, %v2869_v41  ;;  %v1905_v5 = vcombine.low %v2977_v54, %v2887_v51 }
  0x50   :  { %2232 = vmatprep.subr.bf16.mxu0 %v2401_v11  ;;  %v1512_v63 = vrot.slane %v1510_v40, 5  ;;  %v1518_v8 = vshll.u32 %v3013_v43, 16  ;;  %v1906_v41 = vcombine.low %v2896_v61, %v2908_v37  ;;  %v1040_v54 = vshrl.u32 %v2924_v62, 16 }
  0x51   :  { %v1503_v53 = vrot.slane %v1501_v22, 4 }
  0x52   :  { %2117 = vmatmul.mubr.msk.bf16.gmra.mrb[8].mxu1 %vm331_vm2, %v1873_v34 }
  0x53   :  { %2120 = vmatprep.mubr.msk.bf16.mxu1 %vm331_vm2, %v1874_v0 }
  0x56   :  { %2203 = vmatmul.mubr.msk.bf16.gmra.mrb[4].mxu0 %vm331_vm2, %v1971_v57 }
  0x57   :  { %2206 = vmatprep.mubr.msk.bf16.mxu0 %vm331_vm2, %v1873_v34  ;;  %v1506_v34 = vrot.slane %v1504_v48, 5 }
  0x59   :  { %v1507_v35 = vor.u32 %v1506_v34, %v1503_v53 }
  0x5a   :  { %2121 = vmatmul.mubr.msk.bf16.gmra.mrb[12].mxu1 %vm331_vm2, %v1875_v52 }
  0x5b   :  { %2126 = vmatprep.mubr.msk.bf16.mxu1 %vm331_vm2, %v1901_v38 }
  0x5e   :  { %2207 = vmatmul.mubr.msk.bf16.gmra.mrb[8].mxu0 %vm331_vm2, %v1874_v0  ;;  %v1515_v0 = vshrl.u32 %v3013_v43, 16  ;;  %v1049_v43 = vshll.u32 %v2929_v13, 16 }
  0x5f   :  { %2210 = vmatprep.mubr.msk.bf16.mxu0 %vm331_vm2, %v1875_v52  ;;  %v3228_v52 = vcombine.low %v2478_v4, %v2507_v21  ;;  %v3229_v4 = vcombine.low %v2518_v24, %v2528_v26  ;;  %v3233_v24 = vld [vmem:[#allocation6_spill] sm:$0xff] }
  0x60   :  { %v1517_v37 = vrot.slane %v1515_v0, 4  ;;  %v3234_v26 = vcombine.low %v3233_v24, %v2679_v49  ;;  %v3239_v49 = vld [vmem:[#allocation7_spill] sm:$0xff] }
  0x62   :  { %2127 = vmatmul.mubr.msk.bf16.vlgmr.msra.gmra.mrb[0].mxu1 %vm331_vm2, %v1902_v25 }
  0x63   :  { %2143 = vmatpush3.bf16.msra.mxu1 %v2399_v2  ;;  %2130 = vmatprep.mubr.msk.bf16.mxu1 %vm331_vm2, %v1903_v18  ;;  %v1508_v2 = vrot.slane %v1507_v35, 4 }
  0x64   :  { %2250 = vmatprep.subr.bf16.mxu1 %v2463_v1 }
  0x65   :  { %v1513_v51 = vsel %vm2535_vm3, %v1508_v2, %v1512_v63 }
  0x66   :  { %2211 = vmatmul.mubr.msk.bf16.gmra.mrb[12].mxu0 %vm331_vm2, %v1972_v15  ;;  %v1982_v61 = vcombine.low %v2688_v56, %v1513_v51  ;;  %v1524_v56 = vshll.u32 %v3018_v16, 16 }
  0x67   :  { %2216 = vmatprep.mubr.msk.bf16.mxu0 %vm331_vm2, %v2604_v29  ;;  %v1907_v29 = vcombine.low %v2917_v59, %v2939_v55  ;;  %v1520_v59 = vrot.slane %v1518_v8, 5 }
  0x68   :  { %v1526_v22 = vrot.slane %v1524_v56, 5 }
  0x69   :  { %v1521_v57 = vor.u32 %v1520_v59, %v1517_v37 }
  0x6a   :  { %2131 = vmatmul.mubr.msk.bf16.gmra.mrb[4].mxu1 %vm331_vm2, %v1904_v23 }
  0x6b   :  { %2134 = vmatprep.mubr.msk.bf16.mxu1 %vm331_vm2, %v1905_v5 }
  0x6e   :  { %2217 = vmatmul.mubr.msk.bf16.vlgmr.msra.gmra.mrb[0].mxu0 %vm331_vm2, %v2657_v9  ;;  %v1045_v9 = vrot.slane %v1043_v27, 5 }
  0x6f   :  { %2233 = vmatpush3.bf16.msra.mxu0 %v2401_v11  ;;  %2220 = vmatprep.mubr.msk.bf16.mxu0 %vm331_vm2, %v2674_v44  ;;  %v1042_v11 = vrot.slane %v1040_v54, 4  ;;  %v1908_v44 = vcombine.low %v2945_v36, %v2962_v39  ;;  %v1051_v36 = vrot.slane %v1049_v43, 5  ;;  %v1522_v39 = vrot.slane %v1521_v57, 4 }
  0x71   :  { %v1046_v55 = vor.u32 %v1045_v9, %v1042_v11  ;;  %v1527_v13 = vsel %vm2535_vm3, %v1522_v39, %v1526_v22 }
  0x72   :  { %2135 = vmatmul.mubr.msk.bf16.gmra.mrb[8].mxu1 %vm331_vm2, %v1906_v41 }
  0x73   :  { %2138 = vmatprep.mubr.msk.bf16.mxu1 %vm331_vm2, %v1907_v29  ;;  %v1047_v38 = vrot.slane %v1046_v55, 4 }
  0x76   :  { %2221 = vmatmul.mubr.msk.bf16.gmra.mrb[4].mxu0 %vm331_vm2, %v1982_v61 }
  0x77   :  { %2224 = vmatprep.mubr.msk.bf16.mxu0 %vm331_vm2, %v2828_v10  ;;  %v1052_v10 = vsel %vm2535_vm3, %v1047_v38, %v1051_v36 }
  0x78   :  { %v1983_v21 = vcombine.low %v1052_v10, %v1527_v13 }
  0x7a   :  { %2139 = vmatmul.mubr.msk.bf16.gmra.mrb[12].mxu1 %vm331_vm2, %v1908_v44 }
  0x7b   :  { %2144 = vmatprep.mubr.msk.bf16.mxu1 %vm331_vm2, %v3228_v52 }
  0x7e   :  { %2225 = vmatmul.mubr.msk.bf16.gmra.mrb[8].mxu0 %vm331_vm2, %v2855_v17  ;;  %v3230_v17 = vcombine.low %v2559_v50, %v2572_v60  ;;  %v3236_v50 = vcombine.low %v2768_v30, %v2792_v42  ;;  %v3237_v60 = vcombine.low %v2822_v12, %v2924_v62  ;;  %v3244_v42 = vld [vmem:[#allocation10_spill] sm:$0xff] }
  0x7f   :  { %2228 = vmatprep.mubr.msk.bf16.mxu0 %vm331_vm2, %v2913_v45  ;;  %v3231_v45 = vld [vmem:[#allocation5_spill] sm:$0xff]  ;;  %v1942_v12 = vcombine.low %v3244_v42, %v1052_v10 }
  0x80   :  { %v3232_v28 = vcombine.low %v3231_v45, %v2602_v20  ;;  %v3238_v20 = vcombine.low %v2751_v32, %v2796_v46 }
  0x82   :  { %2145 = vmatmul.mubr.msk.bf16.vlgmr.msra.gmra.mrb[0].mxu1 %vm331_vm2, %v3229_v4 }
  0x83   :  { %2251 = vmatpush3.bf16.msra.mxu1 %v2463_v1  ;;  %2148 = vmatprep.mubr.msk.bf16.mxu1 %vm331_vm2, %v3230_v17  ;;  %v3235_v1 = vcombine.low %v2705_v6, %v2737_v31  ;;  %v3241_v6 = vcombine.low %v3239_v49, %v3240_v7  ;;  %v3242_v31 = vld [vmem:[#allocation9_spill] sm:$0xff] }
  0x84   :  { %v3243_v30 = vcombine.low %v2845_v47, %v3242_v31 }
  0x86   :  { %2229 = vmatmul.mubr.msk.bf16.gmra.mrb[12].mxu0 %vm331_vm2, %v1983_v21 }
  0x87   :  { %2234 = vmatprep.mubr.msk.bf16.mxu0 %vm331_vm2, %v1902_v25 }
  0x8a   :  { %2149 = vmatmul.mubr.msk.bf16.gmra.mrb[4].mxu1 %vm331_vm2, %v3232_v28 }
  0x8b   :  { %2152 = vmatprep.mubr.msk.bf16.mxu1 %vm331_vm2, %v3234_v26 }
  0x8e   :  { %2235 = vmatmul.mubr.msk.bf16.vlgmr.msra.gmra.mrb[0].mxu0 %vm331_vm2, %v1903_v18  ;;  %v3178_v18 = vld [vmem:[%s3210_s2] ss:$0 sm:$0xff]  ;;  %s2434_s2 = smov [#allocation2]  }
  0x8f   :  { %2238 = vmatprep.mubr.msk.bf16.mxu0 %vm331_vm2, %v1904_v23  ;;  %s1840_s29 = sshll.u32 %s2434_s2, 4  ;;  %s1841_s29 = int_to_ptr.vmem [resolvable:$true] %s1840_s29 }
  0x90   :  { %s2410_s30 = scalar_lea.vmem %s1841_s29, 2048  ;;  %p2415_p1 = scmp.lt.s32.totalorder %s1841_s29, %s1841_s29 }
  0x91   :  { %p2411_p0 = scmp.ne.s32.totalorder %s1841_s29, %s2410_s30  ;;  %p2416_p2 = scmp.lt.s32.totalorder %s2410_s30, %s2410_s30 }
  0x92   :  { %2153 = vmatmul.mubr.msk.bf16.gmra.mrb[8].mxu1 %vm331_vm2, %v3235_v1 }
  0x93   :  { %2156 = vmatprep.mubr.msk.bf16.mxu1 %vm331_vm2, %v3236_v50  ;;  %p2417_p3 = por %p2416_p2, %p2415_p1 }
  0x95   :  { %p2418_p4 = pnand %p2417_p3, %p2411_p0 }
  0x96   :  { %2239 = vmatmul.mubr.msk.bf16.gmra.mrb[4].mxu0 %vm331_vm2, %v1995_v14 }
  0x97   :  { %2242 = vmatprep.mubr.msk.bf16.mxu0 %vm331_vm2, %v1906_v41 }
  0x9a   :  { %2157 = vmatmul.mubr.msk.bf16.gmra.mrb[12].mxu1 %vm331_vm2, %v3237_v60 }
  0x9b   :  { %2170 = vmatprep.mubr.msk.bf16.mxu1 %vm331_vm2, %v3238_v20 }
  0x9e   :  { %2243 = vmatmul.mubr.msk.bf16.gmra.mrb[8].mxu0 %vm331_vm2, %v1907_v29 }
  0x9f   :  { %2246 = vmatprep.mubr.msk.bf16.mxu0 %vm331_vm2, %v1908_v44 }
  0xa2   :  { %2171 = vmatmul.mubr.msk.bf16.vlgmr.msra.gmra.mrb[8].mxu1 %vm331_vm2, %v3241_v6 }
  0xa3   :  { %2174 = vmatprep.mubr.msk.bf16.mxu1 %vm331_vm2, %v3243_v30 }
  0xa6   :  { %2247 = vmatmul.mubr.msk.bf16.gmra.mrb[12].mxu0 %vm331_vm2, %v1996_v33 }
  0xaa   :  { %2175 = vmatmul.mubr.msk.bf16.gmra.mrb[12].mxu1 %vm331_vm2, %v1942_v12 }
 0x155   :  { %v2146_v32 = vpop.f32.mrb[0].mxu1 }
 0x156   :  { %v946_v46 = vpop.f32.mrb[1].mxu1 }
 0x157   :  { %v2147_v19 = vpop.f32.mrb[2].mxu1 }
 0x158   :  { %v949_v62 = vpop.f32.mrb[3].mxu1 }
 0x15d   :  { %v2150_v14 = vpop.f32.mrb[4].mxu1 }
 0x15e   :  { %v962_v16 = vpop.f32.mrb[5].mxu1 }
 0x15f   :  { %v2151_v25 = vpop.f32.mrb[6].mxu1 }
 0x160   :  { %v965_v48 = vpop.f32.mrb[7].mxu1 }
 0x161   :  { %v2236_v47 = vpop.f32.mrb[0].mxu0 }
 0x162   :  { %v2252_v15 = vadd.f32 %v2236_v47, %v2146_v32  ;;  %v1717_v3 = vpop.f32.mrb[1].mxu0 }
 0x163   :  { %v2253_v58 = vadd.f32 %v1717_v3, %v946_v46  ;;  %v2237_v33 = vpop.f32.mrb[2].mxu0 }
 0x164   :  { %v1805_v53 = vadd.f32 %v2252_v15, %v3178_v18  ;;  %v2254_v34 = vadd.f32 %v2237_v33, %v2147_v19  ;;  %v1720_v23 = vpop.f32.mrb[3].mxu0 }
 0x165   :  { %v1803_v5 = vadd.f32 %v2253_v58, %v3178_v18  ;;  %v2255_v35 = vadd.f32 %v1720_v23, %v949_v62 }
 0x166   :  { %1821 = vst [vmem:[#allocation2 + $0x10] sm:$0xff] %v1805_v53  ;;  %v1806_v40 = vadd.f32 %v2254_v34, %v3178_v18 }
 0x167   :  { %1819 = vst [vmem:[#allocation2] sm:$0xff] %v1803_v5  ;;  %v1804_v2 = vadd.f32 %v2255_v35, %v3178_v18 }
 0x168   :  { %1822 = vst [vmem:[#allocation2 + $0x18] sm:$0xff] %v1806_v40 }
 0x169   :  { %1820 = vst [vmem:[#allocation2 + $0x8] sm:$0xff] %v1804_v2  ;;  %v2240_v63 = vpop.f32.mrb[4].mxu0 }
 0x16a   :  { %v2256_v0 = vadd.f32 %v2240_v63, %v2150_v14  ;;  %v1733_v8 = vpop.f32.mrb[5].mxu0 }
 0x16b   :  { %v2257_v41 = vadd.f32 %v1733_v8, %v962_v16  ;;  %v2241_v29 = vpop.f32.mrb[6].mxu0 }
 0x16c   :  { %v1809_v51 = vadd.f32 %v2256_v0, %v3178_v18  ;;  %v2258_v54 = vadd.f32 %v2241_v29, %v2151_v25  ;;  %v1736_v27 = vpop.f32.mrb[7].mxu0 }
 0x16d   :  { %v1807_v61 = vadd.f32 %v2257_v41, %v3178_v18  ;;  %v2259_v11 = vadd.f32 %v1736_v27, %v965_v48 }
 0x16e   :  { %1825 = vst [vmem:[#allocation2 + $0x30] sm:$0xff] %v1809_v51  ;;  %v1810_v9 = vadd.f32 %v2258_v54, %v3178_v18 }
 0x16f   :  { %1823 = vst [vmem:[#allocation2 + $0x20] sm:$0xff] %v1807_v61  ;;  %v1808_v37 = vadd.f32 %v2259_v11, %v3178_v18 }
 0x170   :  { %1826 = vst [vmem:[#allocation2 + $0x38] sm:$0xff] %v1810_v9 }
 0x171   :  { %1824 = vst [vmem:[#allocation2 + $0x28] sm:$0xff] %v1808_v37  ;;  %v2244_v59 = vpop.f32.mrb[8].mxu0 }
 0x172   :  { %v1749_v44 = vpop.f32.mrb[9].mxu0 }
 0x173   :  { %v2245_v55 = vpop.f32.mrb[10].mxu0 }
 0x174   :  { %v1752_v43 = vpop.f32.mrb[11].mxu0 }
 0x175   :  { %v2172_v57 = vpop.f32.mrb[8].mxu1 }
 0x176   :  { %v2260_v56 = vadd.f32 %v2244_v59, %v2172_v57  ;;  %v1159_v52 = vpop.f32.mrb[9].mxu1 }
 0x177   :  { %v2261_v38 = vadd.f32 %v1749_v44, %v1159_v52  ;;  %v2173_v36 = vpop.f32.mrb[10].mxu1 }
 0x178   :  { %v1813_v39 = vadd.f32 %v2260_v56, %v3178_v18  ;;  %v2262_v22 = vadd.f32 %v2245_v55, %v2173_v36  ;;  %v1162_v10 = vpop.f32.mrb[11].mxu1 }
 0x179   :  { %v1811_v13 = vadd.f32 %v2261_v38, %v3178_v18  ;;  %v2263_v4 = vadd.f32 %v1752_v43, %v1162_v10  ;;  %v2248_v21 = vpop.f32.mrb[12].mxu0 }
 0x17a   :  { %1829 = vst [vmem:[#allocation2 + $0x50] sm:$0xff] %v1813_v39  ;;  %v1814_v17 = vadd.f32 %v2262_v22, %v3178_v18  ;;  %v1765_v45 = vpop.f32.mrb[13].mxu0 }
 0x17b   :  { %1827 = vst [vmem:[#allocation2 + $0x40] sm:$0xff] %v1811_v13  ;;  %v1812_v28 = vadd.f32 %v2263_v4, %v3178_v18  ;;  %v2249_v24 = vpop.f32.mrb[14].mxu0 }
 0x17c   :  { %1830 = vst [vmem:[#allocation2 + $0x58] sm:$0xff] %v1814_v17  ;;  %v1768_v26 = vpop.f32.mrb[15].mxu0 }
 0x17d   :  { %1828 = vst [vmem:[#allocation2 + $0x48] sm:$0xff] %v1812_v28  ;;  %v2176_v1 = vpop.f32.mrb[12].mxu1 }
 0x17e   :  { %v2264_v50 = vadd.f32 %v2248_v21, %v2176_v1  ;;  %v1175_v60 = vpop.f32.mrb[13].mxu1 }
 0x17f   :  { %v2265_v20 = vadd.f32 %v1765_v45, %v1175_v60  ;;  %v2177_v49 = vpop.f32.mrb[14].mxu1 }
 0x180   :  { %v1817_v7 = vadd.f32 %v2264_v50, %v3178_v18  ;;  %v2266_v6 = vadd.f32 %v2249_v24, %v2177_v49  ;;  %v1178_v31 = vpop.f32.mrb[15].mxu1 }
 0x181   :  { %v1815_v30 = vadd.f32 %v2265_v20, %v3178_v18  ;;  %v2267_v42 = vadd.f32 %v1768_v26, %v1178_v31 }
 0x182   :  { %1833 = vst [vmem:[#allocation2 + $0x70] sm:$0xff] %v1817_v7  ;;  %v1818_v12 = vadd.f32 %v2266_v6, %v3178_v18 }
 0x183   :  { %1831 = vst [vmem:[#allocation2 + $0x60] sm:$0xff] %v1815_v30  ;;  %v1816_v32 = vadd.f32 %v2267_v42, %v3178_v18 }
 0x184   :  { %1834 = vst [vmem:[#allocation2 + $0x78] sm:$0xff] %v1818_v12 }
 0x185   :  { %1832 = vst [vmem:[#allocation2 + $0x68] sm:$0xff] %v1816_v32 }
 0x186   :  { %2421 = shalt.err (!%p2418_p4)
}
 0x187   :  { %s2422_s6 = scalar_lea.hbm %s3211_s3, 2048 }
 0x188   :  { %p2423_p5 = scmp.ne.s32.totalorder %s3211_s3, %s2422_s6  ;;  %p2426_p6 = scmp.lt.u32.totalorder %s2422_s6, %s3211_s3 }
 0x18a   :  { %p2428_p7 = pnand %p2426_p6, %p2423_p5 }
 0x18c   :  { %2431 = shalt.err (!%p2428_p7)
}
 0x18d   :  { %s2435_s11 = smov 128   ;;  %s2436_s12 = smov 8  }
 0x18e   :  { %1846 = dma.vmem_to_hbm [thread:$0]  %s1841_s29, 2048, %s3211_s3, [#allocation3], %s2435_s11, %s2435_s11, %s2436_s12  }
 0x18f   :  { %2432 = dma.done.wait [#allocation3], 2048  }
 0x190   :  { %2433 = vsyncadd [#allocation3], 4294965248 }
 0x191   :  { %1850 = vsyncpa [#allocation3], 1 }

</bundles_post_ra>
